<compile_context>
chip_gen: v5e
topology: v5e:2x2
jax: 0.10.0
libtpu: 0.0.40
codegen_flags: <defaults>
</compile_context>

<pallas_src>
import jax
import jax.numpy as jnp
from jax.experimental import pallas as pl
from jax.experimental.pallas import tpu as pltpu

_LANES = 128          # TPU lane width; feature axes are zero-padded to this.
_OUT_PAD = 128        # lane-dense output block width (>=128 -> unmasked stores).
_TB_CAP = 1024        # max batch-tile rows; VMEM footprint stays ~1.5 MiB.
_MXU_L3_MIN_TB = 512  # layer-3 moves onto the MXU at/above this tile size.

# f32 slab row layout (biases + f32 W3 column + f32 W1 block).
_R_B1, _R_B2, _R_B3, _R_W3ROW, _R_W1 = 0, 1, 2, 3, 8
# bf16 slab row layout (W2 block, W3 block).
_R_W2, _R_W3, _ROWS_W = 0, _LANES, 2 * _LANES


def _round_up(x, m):
    return (x + m - 1) // m * m


def _in_pad(n_input):
    return _round_up(n_input, 8)          # f32 sublane tile is 8 rows


def pack_params(params):
    """Pack (w1, b1, w2, b2, w3, b3) into two resident buffers.

    * bf16 (256, 128) weight slab: zero-padded W2 and W3 (already in MXU compute
      dtype -> no per-step casts, half the resident weight bytes).
    * f32 (8 + in_pad, 128) slab: bias rows, an f32 copy of the W3 column (used by
      the single-output VPU layer-3 path), and the tiny zero-padded W1 (layer 1
      runs in f32).

    Weights are (in_features, out_features); biases are (1, out_features).
    Run once; both buffers are reused (and stay VMEM-resident) for every call.
    """
    w1, b1, w2, b2, w3, b3 = params
    n_input, n_features = w1.shape
    n_output = w3.shape[1]
    assert 1 <= n_input <= _LANES and 1 <= n_features <= _LANES and 1 <= n_output <= _LANES
    in_pad = _in_pad(n_input)

    wt = jnp.zeros((_ROWS_W, _LANES), jnp.bfloat16)
    wt = wt.at[_R_W2:_R_W2 + n_features, :n_features].set(w2.astype(jnp.bfloat16))
    wt = wt.at[_R_W3:_R_W3 + n_features, :n_output].set(w3.astype(jnp.bfloat16))

    fp = jnp.zeros((_R_W1 + in_pad, _LANES), jnp.float32)
    fp = fp.at[_R_B1, :n_features].set(b1.astype(jnp.float32)[0])
    fp = fp.at[_R_B2, :n_features].set(b2.astype(jnp.float32)[0])
    fp = fp.at[_R_B3, :n_output].set(b3.astype(jnp.float32)[0])
    if n_output == 1:
        fp = fp.at[_R_W3ROW, :n_features].set(w3.astype(jnp.float32)[:, 0])
    fp = fp.at[_R_W1:_R_W1 + n_input, :n_features].set(w1.astype(jnp.float32))
    return (wt, fp), (n_input, n_features, n_output)


def _make_kernel(in_pad, n_output, tb):
    # MXU layer-3 for multi-column outputs and for large tiles (keeps the per-row
    # cross-lane reduce + lane broadcast off the XLU, which only has 2 units on
    # v6e/v7x); VPU/XLU layer-3 at small tiles (rollout path: skips a third MXU
    # pass / result-FIFO drain).
    use_mxu_l3 = (n_output > 1) or (tb >= _MXU_L3_MIN_TB)

    def kernel(x_ref, wt_ref, fp_ref, o_ref):
        # x_ref: (tb, in_pad) f32 | wt_ref: (256, 128) bf16 | fp_ref: (8+in_pad, 128) f32
        # o_ref: (tb, 128) bf16
        # Layer 1: tiny contraction (K = in_pad) -> run fully in f32 on the MXU.
        h1 = jnp.dot(x_ref[...], fp_ref[_R_W1:_R_W1 + in_pad, :],
                     preferred_element_type=jnp.float32)
        h1 = jnp.maximum(h1 + fp_ref[_R_B1:_R_B1 + 1, :], 0.0)

        # Layer 2: bf16 MXU operands, f32 accumulate. Padded lanes of h1 are exactly
        # zero (zero-padded W1 columns, zero-padded b1, ReLU(0) = 0), so the 128-wide
        # contraction equals the n_features-wide one.
        h2 = jnp.dot(h1.astype(jnp.bfloat16), wt_ref[_R_W2:_R_W2 + _LANES, :],
                     preferred_element_type=jnp.float32)
        h2 = jnp.maximum(h2 + fp_ref[_R_B2:_R_B2 + 1, :], 0.0)

        # Layer 3.
        if use_mxu_l3:
            # Zero-padded (128, 128) bf16 W3 block: answer in lanes [:n_output],
            # exact zeros elsewhere (bias row is also zero-padded). MXU has slack.
            out = jnp.dot(h2.astype(jnp.bfloat16), wt_ref[_R_W3:_R_W3 + _LANES, :],
                          preferred_element_type=jnp.float32)
            out = out + fp_ref[_R_B3:_R_B3 + 1, :]
        else:
            # Single output column on VPU (lane multiply) + XLU (cross-lane reduce).
            # Bias added on the narrow (tb, 1) column, then lane-broadcast so the
            # store stays lane-dense / unmasked.
            s = jnp.sum(h2 * fp_ref[_R_W3ROW:_R_W3ROW + 1, :], axis=-1, keepdims=True)
            s = s + fp_ref[_R_B3:_R_B3 + 1, 0:1]
            out = jnp.broadcast_to(s, (tb, _OUT_PAD))
        o_ref[...] = out.astype(o_ref.dtype)

    return kernel


def actor_forward(state, packed, dims, tb=None):
    """state: (B, 1, n_input) or (B, n_input). Returns (B, n_output) float32."""
    n_input, n_features, n_output = dims
    wt, fp = packed
    in_pad = _in_pad(n_input)

    if state.ndim == 3 and state.shape[1] == 1:
        state = jnp.squeeze(state, axis=1)        # torch.squeeze(state, 1)
    state = state.astype(jnp.float32)             # .float()
    B = state.shape[0]

    # Batch tiling: one tile up to _TB_CAP rows; above that, an EVEN number of tiles
    # with near-equal real rows so v7x's two TensorCores each take half of the
    # "parallel" grid. Bigger tiles are free compute-wise (MXU slack is huge) and fit
    # easily in VMEM, so fewer ~0.35 us grid steps is the dominant effect.
    if tb is None:
        if B <= _TB_CAP:
            tb = _round_up(B, 8)
        else:
            n_tiles = -(-B // _TB_CAP)            # cdiv
            if n_tiles % 2:
                n_tiles += 1
            tb = _round_up(-(-B // n_tiles), 16)
    assert tb % 8 == 0 and tb > 0
    b_pad = _round_up(B, tb)

    # One pad op: batch rows to a tile multiple, feature lanes to the zero-extended
    # W1 row count (padding rows/lanes contract against zero weights).
    x = jnp.pad(state, ((0, b_pad - B), (0, in_pad - n_input)))

    out = pl.pallas_call(
        _make_kernel(in_pad, n_output, tb),
        out_shape=jax.ShapeDtypeStruct((b_pad, _OUT_PAD), jnp.bfloat16),
        grid=(b_pad // tb,),
        in_specs=[
            pl.BlockSpec((tb, in_pad), lambda i: (i, 0)),              # state tile
            pl.BlockSpec((_ROWS_W, _LANES), lambda i: (0, 0)),         # bf16 W2/W3 (resident)
            pl.BlockSpec((_R_W1 + in_pad, _LANES), lambda i: (0, 0)),  # f32 biases/W1 (resident)
        ],
        out_specs=pl.BlockSpec((tb, _OUT_PAD), lambda i: (i, 0)),
        compiler_params=pltpu.CompilerParams(
            dimension_semantics=("parallel",)),                        # shard batch across TCs (v7x)
    )(x, wt, fp)
    return out[:B, :n_output].astype(jnp.float32)


def init_params(key, n_input, n_features, n_output):
    """Mirrors the PyTorch module init: xavier_uniform_ with relu/linear gains,
    nn.Linear default bias init. Weights returned transposed to (in, out)."""
    def xavier(k, fan_in, fan_out, gain):
        limit = gain * jnp.sqrt(6.0 / (fan_in + fan_out))
        return jax.random.uniform(k, (fan_in, fan_out), jnp.float32, -limit, limit)

    def bias(k, fan_in, fan_out):
        bound = 1.0 / jnp.sqrt(fan_in)
        return jax.random.uniform(k, (1, fan_out), jnp.float32, -bound, bound)

    ks = jax.random.split(key, 6)
    relu_gain = jnp.sqrt(2.0)
    w1 = xavier(ks[0], n_input, n_features, relu_gain)
    b1 = bias(ks[1], n_input, n_features)
    w2 = xavier(ks[2], n_features, n_features, relu_gain)
    b2 = bias(ks[3], n_features, n_features)
    w3 = xavier(ks[4], n_features, n_output, 1.0)
    b3 = bias(ks[5], n_features, n_output)
    return (w1, b1, w2, b2, w3, b3)


def actor_forward_ref(state, params):
    """Pure-JAX f32 reference for correctness checking."""
    if state.ndim == 3 and state.shape[1] == 1:
        state = jnp.squeeze(state, axis=1)
    x = state.astype(jnp.float32)
    w1, b1, w2, b2, w3, b3 = params
    h1 = jnp.maximum(x @ w1 + b1, 0.0)
    h2 = jnp.maximum(h1 @ w2 + b2, 0.0)
    return h2 @ w3 + b3


if __name__ == "__main__":
    # Pendulum-v1: observation dim 3, action dim 1; 32 hidden features.
    batch, n_input, n_features, n_output = 8, 3, 32, 1

    key = jax.random.PRNGKey(0)
    k_state, k_params, k_state2, k_state3 = jax.random.split(key, 4)

    params = init_params(k_params, n_input, n_features, n_output)
    packed, dims = pack_params(params)            # packed once, reused every call

    # The module squeezes dim 1, so feed (batch, 1, n_input) like the torch code.
    state = jax.random.normal(k_state, (batch, 1, n_input), jnp.float32)
    out = jax.block_until_ready(actor_forward(state, packed, dims))
    ref = actor_forward_ref(state, params)
    assert out.shape == (batch, n_output)
    # bf16 MXU operands / bf16 output slab (f32 accumulate) -> loose tolerance.
    assert jnp.allclose(out, ref, atol=5e-2, rtol=5e-2), float(jnp.max(jnp.abs(out - ref)))

    # Ragged batch + explicit small tile: multi-step grid, batch padding,
    # resident-weight index_map, VPU/XLU layer-3 path.
    state2 = jax.random.normal(k_state2, (40, 1, n_input), jnp.float32)
    out2 = jax.block_until_ready(actor_forward(state2, packed, dims, tb=16))
    ref2 = actor_forward_ref(state2, params)
    assert out2.shape == (40, n_output)
    assert jnp.allclose(out2, ref2, atol=5e-2, rtol=5e-2), float(jnp.max(jnp.abs(out2 - ref2)))

    # Large batch: even 2-tile split (one tile per v7x TensorCore) + MXU layer-3 path.
    state3 = jax.random.normal(k_state3, (1200, n_input), jnp.float32)
    out3 = jax.block_until_ready(actor_forward(state3, packed, dims))
    ref3 = actor_forward_ref(state3, params)
    assert out3.shape == (1200, n_output)
    assert jnp.allclose(out3, ref3, atol=5e-2, rtol=5e-2), float(jnp.max(jnp.abs(out3 - ref3)))

    print("KERNEL_OK")
</pallas_src>

<mosaic_0001>
module attributes {stable_mosaic.version = 11 : i64} {
  func.func @kernel(%arg0: i32, %arg1: memref<8x8xf32, #tpu.memory_space<vmem>>, %arg2: memref<256x128xbf16, #tpu.memory_space<vmem>>, %arg3: memref<16x128xf32, #tpu.memory_space<vmem>>, %arg4: memref<8x128xbf16, #tpu.memory_space<vmem>>) attributes {dimension_semantics = [#tpu.dimension_semantics<parallel>], iteration_bounds = array<i64: 1>, scalar_prefetch = 0 : i64, scratch_operands = 0 : i64, tpu.core_type = #tpu.core_type<tc>, window_params = [{transform_indices = @transform_0, window_bounds = array<i64: 8, 8>}, {pipeline_mode = #tpu.pipeline_mode<synchronous>, transform_indices = @transform_1, window_bounds = array<i64: 256, 128>}, {pipeline_mode = #tpu.pipeline_mode<synchronous>, transform_indices = @transform_2, window_bounds = array<i64: 16, 128>}, {transform_indices = @transform_3, window_bounds = array<i64: 8, 128>}]} {
    %c0 = arith.constant 0 : index
    %c0_0 = arith.constant 0 : index
    %0 = vector.load %arg1[%c0, %c0_0] : memref<8x8xf32, #tpu.memory_space<vmem>>, vector<8x8xf32>
    %c8 = arith.constant 8 : index
    %c0_1 = arith.constant 0 : index
    %1 = vector.load %arg3[%c8, %c0_1] : memref<16x128xf32, #tpu.memory_space<vmem>>, vector<8x128xf32>
    %cst = arith.constant dense<0.000000e+00> : vector<8x128xf32>
    %2 = tpu.matmul %0, %1, %cst {dimension_numbers = #tpu.dot_dimension_numbers<[1], [0], [0], [1], [0, 0, 1, 1], [], []>} : vector<8x8xf32>, vector<8x128xf32>, vector<8x128xf32> -> vector<8x128xf32>
    %c0_2 = arith.constant 0 : index
    %c0_3 = arith.constant 0 : index
    %3 = vector.load %arg3[%c0_2, %c0_3] : memref<16x128xf32, #tpu.memory_space<vmem>>, vector<1x128xf32>
    %4 = vector.broadcast %3 : vector<1x128xf32> to vector<8x128xf32>
    %5 = arith.addf %2, %4 : vector<8x128xf32>
    %cst_4 = arith.constant 0.000000e+00 : f32
    %6 = vector.broadcast %cst_4 : f32 to vector<8x128xf32>
    %7 = arith.maximumf %5, %6 : vector<8x128xf32>
    %8 = arith.truncf %7 : vector<8x128xf32> to vector<8x128xbf16>
    %c0_5 = arith.constant 0 : index
    %c0_6 = arith.constant 0 : index
    %9 = vector.load %arg2[%c0_5, %c0_6] : memref<256x128xbf16, #tpu.memory_space<vmem>>, vector<128x128xbf16>
    %cst_7 = arith.constant dense<0.000000e+00> : vector<8x128xf32>
    %10 = tpu.matmul %8, %9, %cst_7 {dimension_numbers = #tpu.dot_dimension_numbers<[1], [0], [0], [1], [0, 0, 1, 1], [], []>} : vector<8x128xbf16>, vector<128x128xbf16>, vector<8x128xf32> -> vector<8x128xf32>
    %c1 = arith.constant 1 : index
    %c0_8 = arith.constant 0 : index
    %11 = vector.load %arg3[%c1, %c0_8] : memref<16x128xf32, #tpu.memory_space<vmem>>, vector<1x128xf32>
    %12 = vector.broadcast %11 : vector<1x128xf32> to vector<8x128xf32>
    %13 = arith.addf %10, %12 : vector<8x128xf32>
    %cst_9 = arith.constant 0.000000e+00 : f32
    %14 = vector.broadcast %cst_9 : f32 to vector<8x128xf32>
    %15 = arith.maximumf %13, %14 : vector<8x128xf32>
    %c3 = arith.constant 3 : index
    %c0_10 = arith.constant 0 : index
    %16 = vector.load %arg3[%c3, %c0_10] : memref<16x128xf32, #tpu.memory_space<vmem>>, vector<1x128xf32>
    %17 = vector.broadcast %16 : vector<1x128xf32> to vector<8x128xf32>
    %18 = arith.mulf %15, %17 : vector<8x128xf32>
    %cst_11 = arith.constant dense<0.000000e+00> : vector<8xf32>
    %19 = vector.multi_reduction <add>, %18, %cst_11 [1] : vector<8x128xf32> to vector<8xf32>
    %20 = vector.shape_cast %19 : vector<8xf32> to vector<8x1xf32>
    %c2 = arith.constant 2 : index
    %c0_12 = arith.constant 0 : index
    %21 = vector.load %arg3[%c2, %c0_12] : memref<16x128xf32, #tpu.memory_space<vmem>>, vector<1x1xf32>
    %22 = vector.broadcast %21 : vector<1x1xf32> to vector<8x1xf32>
    %23 = arith.addf %20, %22 : vector<8x1xf32>
    %24 = vector.shape_cast %23 : vector<8x1xf32> to vector<8x1xf32>
    %25 = vector.broadcast %24 : vector<8x1xf32> to vector<8x128xf32>
    %26 = arith.truncf %25 : vector<8x128xf32> to vector<8x128xbf16>
    %c0_13 = arith.constant 0 : index
    %c0_14 = arith.constant 0 : index
    %27 = vector.load %arg4[%c0_13, %c0_14] : memref<8x128xbf16, #tpu.memory_space<vmem>>, vector<8x128xbf16>
    tpu.vector_store %arg4[%c0_13, %c0_14], %26 {strides = array<i32>} : memref<8x128xbf16, #tpu.memory_space<vmem>>, vector<8x128xbf16>,
    return
  }
  func.func @transform_0(%arg0: i32) -> (i32, i32) {
    %c0_i32 = arith.constant 0 : i32
    %c0_i32_0 = arith.constant 0 : i32
    return %arg0, %c0_i32 : i32, i32
  }
  func.func @transform_1(%arg0: i32) -> (i32, i32) {
    %c0_i32 = arith.constant 0 : i32
    %c0_i32_0 = arith.constant 0 : i32
    %c0_i32_1 = arith.constant 0 : i32
    return %c0_i32, %c0_i32_0 : i32, i32
  }
  func.func @transform_2(%arg0: i32) -> (i32, i32) {
    %c0_i32 = arith.constant 0 : i32
    %c0_i32_0 = arith.constant 0 : i32
    %c0_i32_1 = arith.constant 0 : i32
    return %c0_i32, %c0_i32_0 : i32, i32
  }
  func.func @transform_3(%arg0: i32) -> (i32, i32) {
    %c0_i32 = arith.constant 0 : i32
    %c0_i32_0 = arith.constant 0 : i32
    return %arg0, %c0_i32 : i32, i32
  }
}

</mosaic_0001>

<bundles_post_ra>
// kernel: tpu_custom_call.1
= control target key start
LH: loop header
LB: loop body
LE: loop exit
PB: predicated region body
PF: predicated region fallthrough
CT: control target
= control target key end

     0   :  { %8 = vsyncpa [#allocation3], 0  ;;  %s401_s0 = inlined_call_operand.hbm [shape: f32[8,8], index: 0, kind: input, shape index: {}]   ;;  %s402_s1 = inlined_call_operand.hbm [shape: bf16[256,128], index: 1, kind: input, shape index: {}]   ;;  %s403_s2 = inlined_call_operand.hbm [shape: f32[16,128], index: 2, kind: input, shape index: {}]   ;;  %s404_s3 = inlined_call_operand.hbm [shape: bf16[8,128], index: 3, kind: output, shape index: {}]  }
   0x1   :  { %9 = vsyncpa [#allocation6], 0  ;;  %s26_s14 = sshll.u32 %s402_s1, 4  ;;  %s27_s14 = int_to_ptr.hbm [resolvable:$true] %s26_s14 }
   0x2   :  { %10 = vsyncpa [#allocation4], 0  ;;  %s360_s15 = smov [#allocation5]   ;;  %s16_s19 = sshll.u32 %s401_s0, 4  ;;  %s17_s19 = int_to_ptr.hbm [resolvable:$true] %s16_s19 }
   0x3   :  { %s28_s16 = sshll.u32 %s360_s15, 4  ;;  %s361_s20 = smov 64   ;;  %s29_s16 = int_to_ptr.vmem [resolvable:$true] %s28_s16 }
   0x4   :  { %s362_s21 = smov 4   ;;  %s363_s22 = smov [#allocation2]  }
   0x5   :  { %34 = dma.hbm_to_vmem [thread:$0]  %s27_s14, 2048, %s29_s16, [#allocation6], %s361_s20, %s361_s20, %s362_s21  }
   0x6   :  { %s18_s23 = sshll.u32 %s363_s22, 4  ;;  %s39_s26 = sshll.u32 %s403_s2, 4  ;;  %s19_s23 = int_to_ptr.vmem [resolvable:$true] %s18_s23  ;;  %s40_s26 = int_to_ptr.hbm [resolvable:$true] %s39_s26 }
   0x7   :  { %21 = dma.hbm_to_vmem [thread:$0]  %s17_s19, 128, %s19_s23, [#allocation3]  }
   0x8   :  { %s364_s1 = smov [#allocation7]   ;;  %s365_s28 = smov 128  }
   0x9   :  { %s41_s27 = sshll.u32 %s364_s1, 4  ;;  %s366_s29 = smov 8   ;;  %s42_s27 = int_to_ptr.vmem [resolvable:$true] %s41_s27 }
   0xa   :  { %47 = dma.hbm_to_vmem [thread:$0]  %s40_s26, 256, %s42_s27, [#allocation6], %s365_s28, %s365_s28, %s366_s29  }
   0xb   :  { %354 = dma.done.wait [#allocation3], 128  }
   0xc   :  { %355 = vsyncadd [#allocation3], 4294967168 }
   0xd   :  { %356 = dma.done.wait [#allocation6], 2304  }
   0xe   :  { %357 = vsyncadd [#allocation6], 4294964992  ;;  %vm64_vm0 = vcmask 64512   ;;  %v61_v0 = vld [vmem:[#allocation7 + $0x8] sm:$0xff]  ;;  %v60_v1 = vld [vmem:[#allocation2] sm:$0xff]  ;;  %v367_v22 = vmov 0  }
   0xf   :  { %v243_v2 = vld [vmem:[#allocation5 + $0x38] sm:$0xff]  ;;  %83 = vmatpush.msra.mxu0 %v61_v0  ;;  %v242_v3 = vld [vmem:[#allocation5 + $0x30] sm:$0xff]  ;;  %v241_v4 = vld [vmem:[#allocation5 + $0x28] sm:$0xff]  ;;  %253 = vset.pattern.permute.xlu0 %v367_v22  ;;  %s368_s0 = smov [#allocation8]   ;;  %s192_s5 = sshll.u32 %s404_s3, 4  ;;  %s193_s5 = int_to_ptr.hbm [resolvable:$true] %s192_s5 }
  0x10   :  { %203 = vmatmul.msk.f32.vlgmr.msra.gmra.mxu0 %vm64_vm0, %v60_v1  ;;  %156 = vmatpush.bf16.msra.mxu1 %v243_v2  ;;  %v240_v5 = vld [vmem:[#allocation5 + $0x20] sm:$0xff]  ;;  %v239_v6 = vld [vmem:[#allocation5 + $0x18] sm:$0xff]  ;;  %v238_v7 = vld [vmem:[#allocation5 + $0x10] sm:$0xff]  ;;  %s190_s2 = sshll.u32 %s368_s0, 4  ;;  %s191_s2 = int_to_ptr.vmem [resolvable:$true] %s190_s2 }
  0x11   :  { %v237_v8 = vld [vmem:[#allocation5 + $0x8] sm:$0xff]  ;;  %v236_v9 = vld [vmem:[#allocation5] sm:$0xff] }
  0x12   :  { %v254_v10 = vld [vmem:[#allocation7] ss:$0 sm:$0xff]  ;;  %v255_v15 = vld [vmem:[#allocation7 + $0x1] ss:$0 sm:$0xff]  ;;  %v256_v18 = vld [vmem:[#allocation7 + $0x3] ss:$0 sm:$0xff] }
  0x13   :  { %v257_v23 = vld [vmem:[#allocation7 + $0x2] ss:$0 sm:$0xff] }
  0x14   :  { %157 = vmatpush.bf16.msra.mxu1 %v242_v3 }
  0x18   :  { %158 = vmatpush.bf16.msra.mxu1 %v241_v4 }
  0x1c   :  { %159 = vmatpush.bf16.msra.mxu1 %v240_v5 }
  0x20   :  { %160 = vmatpush.bf16.msra.mxu1 %v239_v6 }
  0x24   :  { %161 = vmatpush.bf16.msra.mxu1 %v238_v7 }
  0x28   :  { %162 = vmatpush.bf16.msra.mxu1 %v237_v8 }
  0x2c   :  { %163 = vmatpush.bf16.msra.mxu1 %v236_v9 }
  0x8d   :  { %v85_v11 = vpop.f32.mrf.mxu0 }
  0x8e   :  { %v86_v12 = vadd.f32 %v254_v10, %v85_v11 }
  0x90   :  { %v88_v13 = vmax.f32 %v86_v12, 0.0 }
  0x92   :  { %v89_v14 = vpack.c.bf16 %v88_v13, %v88_v13 }
  0x94   :  { %164 = vmatmul.bf16.vlgmr.msra.gmra.mxu1 %v89_v14 }
 0x111   :  { %v165_v16 = vpop.f32.mrf.mxu1 }
 0x112   :  { %v166_v17 = vadd.f32 %v255_v15, %v165_v16 }
 0x114   :  { %v169_v19 = vmax.f32 %v166_v17, 0.0 }
 0x116   :  { %v172_v20 = vmul.f32 %v256_v18, %v169_v19 }
 0x118   :  { %173 = vadd.xlane.f32.xlu0 %v172_v20 }
 0x119   :  { %v167_v21 = vpop.f32.mrf.mxu1 }
 0x18b   :  { %v174_v24 = vpop.xlane.xlu0 %173 }
 0x18c   :  { %v177_v25 = vadd.f32 %v257_v23, %v174_v24 }
 0x18e   :  { %180 = vperm.xlu0 %253, %v177_v25  }
 0x200   :  { %v181_v26 = vpop.permute.xlu0 %180 }
 0x201   :  { %v183_v27 = vpack.c.bf16 %v181_v26, %v181_v26 }
 0x203   :  { %184 = vst [vmem:[#allocation8] sm:$0xf] %v183_v27 }
 0x204   :  { %195 = dma.vmem_to_hbm [thread:$0]  %s191_s2, 64, %s193_s5, [#allocation4]  }
 0x205   :  { %358 = dma.done.wait [#allocation4], 64  }
 0x206   :  { %359 = vsyncadd [#allocation4], 4294967232 }
 0x207   :  { %200 = vsyncpa [#allocation3], 1 }
 0x208   :  { %201 = vsyncpa [#allocation6], 1 }
 0x209   :  { %202 = vsyncpa [#allocation4], 1 }

</bundles_post_ra>
